<compile_context>
chip_gen: v7x
topology: tpu7x:2x2x1
jax: 0.10.0
libtpu: 0.0.40
codegen_flags: <defaults>
</compile_context>

<pallas_src>
import functools

import jax
import jax.numpy as jnp
from jax.experimental import pallas as pl
from jax.experimental.pallas import tpu as pltpu


# ------------------------------ small helpers --------------------------------
def _row_block(n):
    bn = n if n <= 128 else 128
    assert n % bn == 0
    return bn


def _col_tile(total, cap=512):
    """Largest multiple of 128 that divides `total`, capped at `cap`."""
    best = None
    t = 128
    while t <= min(total, cap):
        if total % t == 0:
            best = t
        t += 128
    return best if best is not None else total


def _ln_f32(x, g, b, eps):
    # x, g, b already float32
    mean = jnp.mean(x, axis=-1, keepdims=True)
    xc = x - mean
    var = jnp.mean(xc * xc, axis=-1, keepdims=True)
    return xc * jax.lax.rsqrt(var + eps) * g + b


_PARALLEL_1D = pltpu.CompilerParams(dimension_semantics=("parallel",))


# ------------------- patch embedding: LN -> Linear -> LN -> +pos -------------
def _patch_embed_kernel(x_ref, g1_ref, b1_ref, w_ref, bias_ref,
                        g2_ref, b2_ref, pos_ref, o_ref, *, eps):
    x = x_ref[...].astype(jnp.float32)
    xn = _ln_f32(x, g1_ref[...].astype(jnp.float32),
                 b1_ref[...].astype(jnp.float32), eps)
    acc = jnp.dot(xn.astype(x_ref.dtype), w_ref[...],
                  preferred_element_type=jnp.float32)
    acc = acc + bias_ref[...].astype(jnp.float32)
    y = _ln_f32(acc, g2_ref[...].astype(jnp.float32),
                b2_ref[...].astype(jnp.float32), eps)
    y = y + pos_ref[...].astype(jnp.float32)          # pos-emb add fused here
    o_ref[...] = y.astype(o_ref.dtype)


def patch_embed(x, g1, b1, w, bias, g2, b2, pos, eps=1e-5):
    n, pd = x.shape
    d = w.shape[1]
    bn = _row_block(n)
    return pl.pallas_call(
        functools.partial(_patch_embed_kernel, eps=eps),
        out_shape=jax.ShapeDtypeStruct((n, d), x.dtype),
        grid=(n // bn,),
        in_specs=[
            pl.BlockSpec((bn, pd), lambda i: (i, 0)),
            pl.BlockSpec((1, pd), lambda i: (0, 0)),
            pl.BlockSpec((1, pd), lambda i: (0, 0)),
            pl.BlockSpec((pd, d), lambda i: (0, 0)),
            pl.BlockSpec((1, d), lambda i: (0, 0)),
            pl.BlockSpec((1, d), lambda i: (0, 0)),
            pl.BlockSpec((1, d), lambda i: (0, 0)),
            pl.BlockSpec((bn, d), lambda i: (i, 0)),
        ],
        out_specs=pl.BlockSpec((bn, d), lambda i: (i, 0)),
        compiler_params=_PARALLEL_1D,
    )(x, g1.reshape(1, pd), b1.reshape(1, pd), w, bias.reshape(1, d),
      g2.reshape(1, d), b2.reshape(1, d), pos)


# -------------- fused pre-norm + QKV projection (weight column-tiled) ---------
def _ln_qkv_kernel(x_ref, g_ref, b_ref, w_ref, o_ref, *, eps):
    # LayerNorm is recomputed per column tile (cheap VPU/XLU work that hides
    # under the MXU matmul); this keeps the column grid axis "parallel" safe
    # for megacore without a cross-core scratch init hazard.
    x = x_ref[...].astype(jnp.float32)
    xn = _ln_f32(x, g_ref[...].astype(jnp.float32),
                 b_ref[...].astype(jnp.float32), eps).astype(x_ref.dtype)
    o_ref[...] = jnp.dot(xn, w_ref[...],
                         preferred_element_type=jnp.float32).astype(o_ref.dtype)


def ln_qkv(x, g, b, wqkv, eps=1e-5):
    n, d = x.shape
    cols = wqkv.shape[1]                    # 3 * inner (scale pre-folded into Q cols)
    tc = _col_tile(cols)
    return pl.pallas_call(
        functools.partial(_ln_qkv_kernel, eps=eps),
        out_shape=jax.ShapeDtypeStruct((n, cols), x.dtype),   # fused QKV buffer
        grid=(cols // tc,),
        in_specs=[
            pl.BlockSpec((n, d), lambda j: (0, 0)),            # full activation rows
            pl.BlockSpec((1, d), lambda j: (0, 0)),
            pl.BlockSpec((1, d), lambda j: (0, 0)),
            pl.BlockSpec((d, tc), lambda j: (0, j)),           # weight column tile
        ],
        out_specs=pl.BlockSpec((n, tc), lambda j: (0, j)),
        compiler_params=_PARALLEL_1D,
    )(x, g.reshape(1, d), b.reshape(1, d), wqkv)


# ------- attention fused with output projection + bias + residual ------------
def _attn_proj_kernel(q_ref, k_ref, v_ref, wo_ref, bo_ref, x_ref, o_ref,
                      acc_ref, *, dh, hpg):
    g = pl.program_id(1)

    @pl.when(g == 0)
    def _():
        # seed accumulator with residual + output-projection bias
        acc_ref[...] = (x_ref[...].astype(jnp.float32)
                        + bo_ref[...].astype(jnp.float32))

    outs = []
    for hh in range(hpg):                          # static unrolled per-head loop
        q = q_ref[:, hh * dh:(hh + 1) * dh]        # (bn, dh) bf16 (scale pre-folded)
        k = k_ref[:, hh * dh:(hh + 1) * dh]        # (N,  dh) bf16
        v = v_ref[:, hh * dh:(hh + 1) * dh]        # (N,  dh) bf16
        # QK^T via contraction on the last dim of both operands (no transpose)
        s = jax.lax.dot_general(q, k, (((1,), (1,)), ((), ())),
                                preferred_element_type=jnp.float32)
        s = s - jnp.max(s, axis=-1, keepdims=True)
        p = jnp.exp(s)
        denom = jnp.sum(p, axis=-1, keepdims=True)
        o_h = jnp.dot(p.astype(v_ref.dtype), v,
                      preferred_element_type=jnp.float32)
        # normalize on the (bn, dh) output, not the (bn, N) probabilities
        outs.append((o_h * pl.reciprocal(denom, approx=True)).astype(wo_ref.dtype))
    o_grp = outs[0] if hpg == 1 else jnp.concatenate(outs, axis=-1)  # (bn, hpg*dh)
    acc_ref[...] += jnp.dot(o_grp, wo_ref[...],
                            preferred_element_type=jnp.float32)

    @pl.when(g == pl.num_programs(1) - 1)
    def _():
        o_ref[...] = acc_ref[...].astype(o_ref.dtype)


def attn_proj(qkv, wo, bo, x_resid, heads, dh):
    n, d = x_resid.shape
    inner = heads * dh
    assert qkv.shape == (n, 3 * inner)
    # heads per group: aim for 256-lane-wide Q/K/V blocks
    hpg = max(1, min(heads, 256 // dh))
    while heads % hpg != 0:
        hpg -= 1
    w = hpg * dh
    qb = inner // w                               # column blocks per Q/K/V section
    bn = _row_block(n)
    n_groups = heads // hpg
    return pl.pallas_call(
        functools.partial(_attn_proj_kernel, dh=dh, hpg=hpg),
        out_shape=jax.ShapeDtypeStruct((n, d), x_resid.dtype),
        grid=(n // bn, n_groups),
        in_specs=[
            pl.BlockSpec((bn, w), lambda i, g: (i, g)),           # Q (row tile)
            pl.BlockSpec((n, w), lambda i, g: (0, qb + g)),       # K (all rows)
            pl.BlockSpec((n, w), lambda i, g: (0, 2 * qb + g)),   # V (all rows)
            pl.BlockSpec((w, d), lambda i, g: (g, 0)),            # Wo row block
            pl.BlockSpec((1, d), lambda i, g: (0, 0)),            # bo
            pl.BlockSpec((bn, d), lambda i, g: (i, 0)),           # residual
        ],
        out_specs=pl.BlockSpec((bn, d), lambda i, g: (i, 0)),
        scratch_shapes=[pltpu.VMEM((bn, d), jnp.float32)],
        compiler_params=pltpu.CompilerParams(
            dimension_semantics=("parallel", "arbitrary")),
    )(qkv, qkv, qkv, wo, bo.reshape(1, d), x_resid)


# ---- fused feed-forward: LN -> W1 -> GELU -> W2 + residual (ff tiled) --------
def _ln_ff_kernel(x_ref, g_ref, b_ref, w1_ref, b1_ref, w2_ref, b2_ref, o_ref,
                  xn_ref, acc_ref, *, eps):
    k = pl.program_id(1)

    @pl.when(k == 0)
    def _():
        x = x_ref[...].astype(jnp.float32)
        xn_ref[...] = _ln_f32(x, g_ref[...].astype(jnp.float32),
                              b_ref[...].astype(jnp.float32), eps
                              ).astype(xn_ref.dtype)
        acc_ref[...] = x + b2_ref[...].astype(jnp.float32)    # residual + b2

    h = jnp.dot(xn_ref[...], w1_ref[...], preferred_element_type=jnp.float32)
    h = h + b1_ref[...].astype(jnp.float32)
    # TODO(synk): PyTorch nn.GELU() default is exact erf-GELU; tanh approximation
    # used here (difference is below bf16 output resolution).
    h = jax.nn.gelu(h, approximate=True)
    acc_ref[...] += jnp.dot(h.astype(xn_ref.dtype), w2_ref[...],
                            preferred_element_type=jnp.float32)

    @pl.when(k == pl.num_programs(1) - 1)
    def _():
        o_ref[...] = acc_ref[...].astype(o_ref.dtype)


def ln_ff(x, g, b, w1, b1, w2, b2, eps=1e-5):
    n, d = x.shape
    ff = w1.shape[1]
    bn = _row_block(n)
    tf = _col_tile(ff)
    return pl.pallas_call(
        functools.partial(_ln_ff_kernel, eps=eps),
        out_shape=jax.ShapeDtypeStruct((n, d), x.dtype),
        grid=(n // bn, ff // tf),
        in_specs=[
            pl.BlockSpec((bn, d), lambda i, k: (i, 0)),
            pl.BlockSpec((1, d), lambda i, k: (0, 0)),
            pl.BlockSpec((1, d), lambda i, k: (0, 0)),
            pl.BlockSpec((d, tf), lambda i, k: (0, k)),    # W1 column tile
            pl.BlockSpec((1, tf), lambda i, k: (0, k)),
            pl.BlockSpec((tf, d), lambda i, k: (k, 0)),    # W2 row tile
            pl.BlockSpec((1, d), lambda i, k: (0, 0)),
        ],
        out_specs=pl.BlockSpec((bn, d), lambda i, k: (i, 0)),
        scratch_shapes=[pltpu.VMEM((bn, d), x.dtype),      # cached LN(x)
                        pltpu.VMEM((bn, d), jnp.float32)],  # f32 accumulator
        compiler_params=pltpu.CompilerParams(
            dimension_semantics=("parallel", "arbitrary")),
    )(x, g.reshape(1, d), b.reshape(1, d), w1, b1.reshape(1, ff),
      w2, b2.reshape(1, d))


# ------------------------------ final LayerNorm -------------------------------
def _layernorm_kernel(x_ref, g_ref, b_ref, o_ref, *, eps):
    x = x_ref[...].astype(jnp.float32)
    y = _ln_f32(x, g_ref[...].astype(jnp.float32),
                b_ref[...].astype(jnp.float32), eps)
    o_ref[...] = y.astype(o_ref.dtype)


def layernorm(x, gamma, beta, eps=1e-5):
    n, d = x.shape
    bn = _row_block(n)
    return pl.pallas_call(
        functools.partial(_layernorm_kernel, eps=eps),
        out_shape=jax.ShapeDtypeStruct((n, d), x.dtype),
        grid=(n // bn,),
        in_specs=[
            pl.BlockSpec((bn, d), lambda i: (i, 0)),
            pl.BlockSpec((1, d), lambda i: (0, 0)),
            pl.BlockSpec((1, d), lambda i: (0, 0)),
        ],
        out_specs=pl.BlockSpec((bn, d), lambda i: (i, 0)),
        compiler_params=_PARALLEL_1D,
    )(x, gamma.reshape(1, d), beta.reshape(1, d))


# ------------------------------- Parameters ----------------------------------
def init_params(key, cfg, dtype=jnp.bfloat16):
    dim = cfg["dim"]
    heads, dh = cfg["heads"], cfg["dim_head"]
    inner = heads * dh
    ff_inner = dim * cfg["ff_mult"]
    p, c = cfg["patch_size"], cfg["channels"]
    patch_dim = c * p * p
    n = (cfg["image_size"] // p) ** 2
    scale = dh ** -0.5

    keys = jax.random.split(key, 4 + cfg["depth"])

    def dense_f32(k, fan_in, fan_out):
        return jax.random.normal(k, (fan_in, fan_out), jnp.float32) * 0.02

    params = {
        # patch_to_embedding: LayerNorm(patch_dim) -> Linear -> LayerNorm(dim)
        "patch_ln1_g": jnp.ones((patch_dim,), dtype),
        "patch_ln1_b": jnp.zeros((patch_dim,), dtype),
        "patch_w": dense_f32(keys[0], patch_dim, dim).astype(dtype),
        "patch_b": jnp.zeros((dim,), dtype),
        "patch_ln2_g": jnp.ones((dim,), dtype),
        "patch_ln2_b": jnp.zeros((dim,), dtype),
        "pos_emb": (jax.random.normal(keys[1], (n, dim), jnp.float32) * 0.02).astype(dtype),
        "final_ln_g": jnp.ones((dim,), dtype),
        "final_ln_b": jnp.zeros((dim,), dtype),
        "layers": [],
    }
    for i in range(cfg["depth"]):
        lk = jax.random.split(keys[4 + i], 6)
        # to_q / to_k / to_v have no bias in x-transformers; fuse into one weight.
        # The attention scale (dh**-0.5) is folded into the Q columns at init
        # (softmax((q*scale) @ k^T) == softmax((x @ (Wq*scale)) @ k^T)).
        wqkv = jnp.concatenate(
            [dense_f32(lk[0], dim, inner) * scale,
             dense_f32(lk[1], dim, inner),
             dense_f32(lk[2], dim, inner)],
            axis=1).astype(dtype)
        params["layers"].append({
            "attn_ln_g": jnp.ones((dim,), dtype),
            "attn_ln_b": jnp.zeros((dim,), dtype),
            "wqkv": wqkv,
            "wo": dense_f32(lk[3], inner, dim).astype(dtype),
            "bo": jnp.zeros((dim,), dtype),
            "ff_ln_g": jnp.ones((dim,), dtype),
            "ff_ln_b": jnp.zeros((dim,), dtype),
            "w1": dense_f32(lk[4], dim, ff_inner).astype(dtype),
            "b1": jnp.zeros((ff_inner,), dtype),
            "w2": dense_f32(lk[5], ff_inner, dim).astype(dtype),
            "b2": jnp.zeros((dim,), dtype),
        })
    return params


# --------------------------------- Forward ------------------------------------
def vit_forward(img, params, cfg):
    p = cfg["patch_size"]
    heads, dh = cfg["heads"], cfg["dim_head"]

    b, c, H, W = img.shape
    h, w = H // p, W // p
    # rearrange 'b c (h p1) (w p2) -> b (h w) (p1 p2 c)'  (plain-JAX glue)
    x = img.reshape(b, c, h, p, w, p).transpose(0, 2, 4, 3, 5, 1).reshape(b, h * w, p * p * c)
    x = x[0]                                             # (N, patch_dim), batch==1

    # patch_to_embedding (LN -> Linear -> LN) + pos_emb, fused; dropout p=0 -> identity
    x = patch_embed(x, params["patch_ln1_g"], params["patch_ln1_b"],
                    params["patch_w"], params["patch_b"],
                    params["patch_ln2_g"], params["patch_ln2_b"],
                    params["pos_emb"])

    for layer in params["layers"]:
        # ---- pre-norm self-attention + out-proj + residual (3 calls -> 2) ----
        qkv = ln_qkv(x, layer["attn_ln_g"], layer["attn_ln_b"], layer["wqkv"])
        x = attn_proj(qkv, layer["wo"], layer["bo"], x, heads, dh)

        # ---- pre-norm feed-forward + residual, fully fused, ff-tiled ----
        x = ln_ff(x, layer["ff_ln_g"], layer["ff_ln_b"],
                  layer["w1"], layer["b1"], layer["w2"], layer["b2"])

    x = layernorm(x, params["final_ln_g"], params["final_ln_b"])
    return x[None]                                       # (1, N, dim) bf16


# ----------------------------------- Main --------------------------------------
if __name__ == "__main__":
    # Small config consistent with the module structure (full module is
    # image_size=256, dim=512, depth=6, heads=16, dim_head=64).
    cfg = dict(image_size=64, patch_size=16, channels=3,
               dim=128, depth=2, heads=4, dim_head=64, ff_mult=4)

    key = jax.random.PRNGKey(0)
    k_img, k_par = jax.random.split(key)
    inp = jax.random.normal(
        k_img, (1, cfg["channels"], cfg["image_size"], cfg["image_size"]),
        dtype=jnp.float32).astype(jnp.bfloat16)

    params = init_params(k_par, cfg)
    out = vit_forward(inp, params, cfg)
    out = jax.block_until_ready(out)

    num_patches = (cfg["image_size"] // cfg["patch_size"]) ** 2
    assert out.shape == (1, num_patches, cfg["dim"])
    assert out.dtype == jnp.bfloat16
    print("KERNEL_OK")
</pallas_src>

<mosaic_0001>
module attributes {stable_mosaic.version = 11 : i64} {
  func.func @_patch_embed_kernel(%arg0: i32, %arg1: memref<16x768xbf16, #tpu.memory_space<vmem>>, %arg2: memref<1x768xbf16, #tpu.memory_space<vmem>>, %arg3: memref<1x768xbf16, #tpu.memory_space<vmem>>, %arg4: memref<768x128xbf16, #tpu.memory_space<vmem>>, %arg5: memref<1x128xbf16, #tpu.memory_space<vmem>>, %arg6: memref<1x128xbf16, #tpu.memory_space<vmem>>, %arg7: memref<1x128xbf16, #tpu.memory_space<vmem>>, %arg8: memref<16x128xbf16, #tpu.memory_space<vmem>>, %arg9: memref<16x128xbf16, #tpu.memory_space<vmem>>) attributes {dimension_semantics = [#tpu.dimension_semantics<parallel>], iteration_bounds = array<i64: 1>, scalar_prefetch = 0 : i64, scratch_operands = 0 : i64, tpu.core_type = #tpu.core_type<tc>, window_params = [{transform_indices = @transform_0, window_bounds = array<i64: 16, 768>}, {pipeline_mode = #tpu.pipeline_mode<synchronous>, transform_indices = @transform_1, window_bounds = array<i64: 1, 768>}, {pipeline_mode = #tpu.pipeline_mode<synchronous>, transform_indices = @transform_2, window_bounds = array<i64: 1, 768>}, {pipeline_mode = #tpu.pipeline_mode<synchronous>, transform_indices = @transform_3, window_bounds = array<i64: 768, 128>}, {pipeline_mode = #tpu.pipeline_mode<synchronous>, transform_indices = @transform_4, window_bounds = array<i64: 1, 128>}, {pipeline_mode = #tpu.pipeline_mode<synchronous>, transform_indices = @transform_5, window_bounds = array<i64: 1, 128>}, {pipeline_mode = #tpu.pipeline_mode<synchronous>, transform_indices = @transform_6, window_bounds = array<i64: 1, 128>}, {transform_indices = @transform_7, window_bounds = array<i64: 16, 128>}, {transform_indices = @transform_8, window_bounds = array<i64: 16, 128>}]} {
    %c0 = arith.constant 0 : index
    %c0_0 = arith.constant 0 : index
    %0 = vector.load %arg1[%c0, %c0_0] : memref<16x768xbf16, #tpu.memory_space<vmem>>, vector<16x768xbf16>
    %1 = arith.extf %0 : vector<16x768xbf16> to vector<16x768xf32>
    %c0_1 = arith.constant 0 : index
    %c0_2 = arith.constant 0 : index
    %2 = vector.load %arg2[%c0_1, %c0_2] : memref<1x768xbf16, #tpu.memory_space<vmem>>, vector<1x768xbf16>
    %3 = arith.extf %2 : vector<1x768xbf16> to vector<1x768xf32>
    %c0_3 = arith.constant 0 : index
    %c0_4 = arith.constant 0 : index
    %4 = vector.load %arg3[%c0_3, %c0_4] : memref<1x768xbf16, #tpu.memory_space<vmem>>, vector<1x768xbf16>
    %5 = arith.extf %4 : vector<1x768xbf16> to vector<1x768xf32>
    %cst = arith.constant dense<0.000000e+00> : vector<16xf32>
    %6 = vector.multi_reduction <add>, %1, %cst [1] : vector<16x768xf32> to vector<16xf32>
    %7 = vector.shape_cast %6 : vector<16xf32> to vector<16x1xf32>
    %cst_5 = arith.constant 7.680000e+02 : f32
    %8 = vector.broadcast %cst_5 : f32 to vector<16x1xf32>
    %9 = arith.divf %7, %8 : vector<16x1xf32>
    %10 = vector.broadcast %9 : vector<16x1xf32> to vector<16x768xf32>
    %11 = arith.subf %1, %10 : vector<16x768xf32>
    %12 = arith.mulf %11, %11 : vector<16x768xf32>
    %cst_6 = arith.constant dense<0.000000e+00> : vector<16xf32>
    %13 = vector.multi_reduction <add>, %12, %cst_6 [1] : vector<16x768xf32> to vector<16xf32>
    %14 = vector.shape_cast %13 : vector<16xf32> to vector<16x1xf32>
    %cst_7 = arith.constant 7.680000e+02 : f32
    %15 = vector.broadcast %cst_7 : f32 to vector<16x1xf32>
    %16 = arith.divf %14, %15 : vector<16x1xf32>
    %cst_8 = arith.constant 9.99999974E-6 : f32
    %17 = vector.broadcast %cst_8 : f32 to vector<16x1xf32>
    %18 = arith.addf %16, %17 : vector<16x1xf32>
    %19 = math.rsqrt %18 : vector<16x1xf32>
    %20 = vector.broadcast %19 : vector<16x1xf32> to vector<16x768xf32>
    %21 = arith.mulf %11, %20 : vector<16x768xf32>
    %22 = vector.broadcast %3 : vector<1x768xf32> to vector<16x768xf32>
    %23 = arith.mulf %21, %22 : vector<16x768xf32>
    %24 = vector.broadcast %5 : vector<1x768xf32> to vector<16x768xf32>
    %25 = arith.addf %23, %24 : vector<16x768xf32>
    %26 = arith.truncf %25 : vector<16x768xf32> to vector<16x768xbf16>
    %c0_9 = arith.constant 0 : index
    %c0_10 = arith.constant 0 : index
    %27 = vector.load %arg4[%c0_9, %c0_10] : memref<768x128xbf16, #tpu.memory_space<vmem>>, vector<768x128xbf16>
    %cst_11 = arith.constant dense<0.000000e+00> : vector<16x128xf32>
    %28 = tpu.matmul %26, %27, %cst_11 {dimension_numbers = #tpu.dot_dimension_numbers<[1], [0], [0], [1], [0, 0, 1, 1], [], []>} : vector<16x768xbf16>, vector<768x128xbf16>, vector<16x128xf32> -> vector<16x128xf32>
    %c0_12 = arith.constant 0 : index
    %c0_13 = arith.constant 0 : index
    %29 = vector.load %arg5[%c0_12, %c0_13] : memref<1x128xbf16, #tpu.memory_space<vmem>>, vector<1x128xbf16>
    %30 = arith.extf %29 : vector<1x128xbf16> to vector<1x128xf32>
    %31 = vector.broadcast %30 : vector<1x128xf32> to vector<16x128xf32>
    %32 = arith.addf %28, %31 : vector<16x128xf32>
    %c0_14 = arith.constant 0 : index
    %c0_15 = arith.constant 0 : index
    %33 = vector.load %arg6[%c0_14, %c0_15] : memref<1x128xbf16, #tpu.memory_space<vmem>>, vector<1x128xbf16>
    %34 = arith.extf %33 : vector<1x128xbf16> to vector<1x128xf32>
    %c0_16 = arith.constant 0 : index
    %c0_17 = arith.constant 0 : index
    %35 = vector.load %arg7[%c0_16, %c0_17] : memref<1x128xbf16, #tpu.memory_space<vmem>>, vector<1x128xbf16>
    %36 = arith.extf %35 : vector<1x128xbf16> to vector<1x128xf32>
    %cst_18 = arith.constant dense<0.000000e+00> : vector<16xf32>
    %37 = vector.multi_reduction <add>, %32, %cst_18 [1] : vector<16x128xf32> to vector<16xf32>
    %38 = vector.shape_cast %37 : vector<16xf32> to vector<16x1xf32>
    %cst_19 = arith.constant 1.280000e+02 : f32
    %39 = vector.broadcast %cst_19 : f32 to vector<16x1xf32>
    %40 = arith.divf %38, %39 : vector<16x1xf32>
    %41 = vector.broadcast %40 : vector<16x1xf32> to vector<16x128xf32>
    %42 = arith.subf %32, %41 : vector<16x128xf32>
    %43 = arith.mulf %42, %42 : vector<16x128xf32>
    %cst_20 = arith.constant dense<0.000000e+00> : vector<16xf32>
    %44 = vector.multi_reduction <add>, %43, %cst_20 [1] : vector<16x128xf32> to vector<16xf32>
    %45 = vector.shape_cast %44 : vector<16xf32> to vector<16x1xf32>
    %cst_21 = arith.constant 1.280000e+02 : f32
    %46 = vector.broadcast %cst_21 : f32 to vector<16x1xf32>
    %47 = arith.divf %45, %46 : vector<16x1xf32>
    %cst_22 = arith.constant 9.99999974E-6 : f32
    %48 = vector.broadcast %cst_22 : f32 to vector<16x1xf32>
    %49 = arith.addf %47, %48 : vector<16x1xf32>
    %50 = math.rsqrt %49 : vector<16x1xf32>
    %51 = vector.broadcast %50 : vector<16x1xf32> to vector<16x128xf32>
    %52 = arith.mulf %42, %51 : vector<16x128xf32>
    %53 = vector.broadcast %34 : vector<1x128xf32> to vector<16x128xf32>
    %54 = arith.mulf %52, %53 : vector<16x128xf32>
    %55 = vector.broadcast %36 : vector<1x128xf32> to vector<16x128xf32>
    %56 = arith.addf %54, %55 : vector<16x128xf32>
    %c0_23 = arith.constant 0 : index
    %c0_24 = arith.constant 0 : index
    %57 = vector.load %arg8[%c0_23, %c0_24] : memref<16x128xbf16, #tpu.memory_space<vmem>>, vector<16x128xbf16>
    %58 = arith.extf %57 : vector<16x128xbf16> to vector<16x128xf32>
    %59 = arith.addf %56, %58 : vector<16x128xf32>
    %60 = arith.truncf %59 : vector<16x128xf32> to vector<16x128xbf16>
    %c0_25 = arith.constant 0 : index
    %c0_26 = arith.constant 0 : index
    %61 = vector.load %arg9[%c0_25, %c0_26] : memref<16x128xbf16, #tpu.memory_space<vmem>>, vector<16x128xbf16>
    tpu.vector_store %arg9[%c0_25, %c0_26], %60 {strides = array<i32>} : memref<16x128xbf16, #tpu.memory_space<vmem>>, vector<16x128xbf16>,
    return
  }
  func.func @transform_0(%arg0: i32) -> (i32, i32) {
    %c0_i32 = arith.constant 0 : i32
    %c0_i32_0 = arith.constant 0 : i32
    return %arg0, %c0_i32 : i32, i32
  }
  func.func @transform_1(%arg0: i32) -> (i32, i32) {
    %c0_i32 = arith.constant 0 : i32
    %c0_i32_0 = arith.constant 0 : i32
    %c0_i32_1 = arith.constant 0 : i32
    return %c0_i32, %c0_i32_0 : i32, i32
  }
  func.func @transform_2(%arg0: i32) -> (i32, i32) {
    %c0_i32 = arith.constant 0 : i32
    %c0_i32_0 = arith.constant 0 : i32
    %c0_i32_1 = arith.constant 0 : i32
    return %c0_i32, %c0_i32_0 : i32, i32
  }
  func.func @transform_3(%arg0: i32) -> (i32, i32) {
    %c0_i32 = arith.constant 0 : i32
    %c0_i32_0 = arith.constant 0 : i32
    %c0_i32_1 = arith.constant 0 : i32
    return %c0_i32, %c0_i32_0 : i32, i32
  }
  func.func @transform_4(%arg0: i32) -> (i32, i32) {
    %c0_i32 = arith.constant 0 : i32
    %c0_i32_0 = arith.constant 0 : i32
    %c0_i32_1 = arith.constant 0 : i32
    return %c0_i32, %c0_i32_0 : i32, i32
  }
  func.func @transform_5(%arg0: i32) -> (i32, i32) {
    %c0_i32 = arith.constant 0 : i32
    %c0_i32_0 = arith.constant 0 : i32
    %c0_i32_1 = arith.constant 0 : i32
    return %c0_i32, %c0_i32_0 : i32, i32
  }
  func.func @transform_6(%arg0: i32) -> (i32, i32) {
    %c0_i32 = arith.constant 0 : i32
    %c0_i32_0 = arith.constant 0 : i32
    %c0_i32_1 = arith.constant 0 : i32
    return %c0_i32, %c0_i32_0 : i32, i32
  }
  func.func @transform_7(%arg0: i32) -> (i32, i32) {
    %c0_i32 = arith.constant 0 : i32
    %c0_i32_0 = arith.constant 0 : i32
    return %arg0, %c0_i32 : i32, i32
  }
  func.func @transform_8(%arg0: i32) -> (i32, i32) {
    %c0_i32 = arith.constant 0 : i32
    %c0_i32_0 = arith.constant 0 : i32
    return %arg0, %c0_i32 : i32, i32
  }
}

</mosaic_0001>

<bundles_post_ra>
// kernel: tpu_custom_call.1
= control target key start
LH: loop header
LB: loop body
LE: loop exit
PB: predicated region body
PF: predicated region fallthrough
CT: control target
= control target key end

     0   :  { %13 = vsyncpa [#allocation3], 0  ;;  %s1422_s0 = inlined_call_operand.hbm [shape: bf16[16,768], index: 0, kind: input, shape index: {}]   ;;  %s1423_s1 = inlined_call_operand.hbm [shape: bf16[1,768], index: 1, kind: input, shape index: {}]   ;;  %s1424_s2 = inlined_call_operand.vmem [shape: bf16[1,768], index: 2, kind: input, shape index: {}]   ;;  %s1425_s3 = inlined_call_operand.hbm [shape: bf16[768,128], index: 3, kind: input, shape index: {}]   ;;  %s1426_s4 = inlined_call_operand.vmem [shape: bf16[1,128], index: 4, kind: input, shape index: {}]   ;;  %s1427_s5 = inlined_call_operand.vmem [shape: bf16[1,128], index: 5, kind: input, shape index: {}]   ;;  %s1428_s6 = inlined_call_operand.vmem [shape: bf16[1,128], index: 6, kind: input, shape index: {}]   ;;  %s1429_s7 = inlined_call_operand.vmem [shape: bf16[16,128], index: 7, kind: input, shape index: {}]   ;;  %s1430_s8 = inlined_call_operand.hbm [shape: bf16[16,128], index: 8, kind: output, shape index: {}]  }
   0x1   :  { %14 = vsyncpa [#allocation6], 0 }
   0x2   :  { %15 = vsyncpa [#allocation4], 0  ;;  %s1180_s27 = smov [#allocation5]   ;;  %s1181_s29 = smov [#allocation2]  }
   0x3   :  { %s34_s28 = sshll.u32 %s1180_s27, 4  ;;  %s21_s30 = sshll.u32 %s1181_s29, 4  ;;  %s35_s28 = int_to_ptr.vmem [resolvable:$true] %s34_s28  ;;  %s1233_s30 = int_to_ptr.vmem [resolvable:$true] %s21_s30 }
   0x4   :  { %s1086_s11 = scalar_lea.hbm %s1423_s1, 96 }
   0x5   :  { %p1087_p0 = scmp.ne.s32.totalorder %s1423_s1, %s1086_s11  ;;  %p1090_p1 = scmp.lt.u32.totalorder %s1086_s11, %s1423_s1 }
   0x7   :  { %p1092_p2 = pnand %p1090_p1, %p1087_p0 }
   0x9   :  { %1095 = shalt.err (!%p1092_p2)
}
   0xa   :  { %s1096_s16 = scalar_lea.vmem %s35_s28, 96  ;;  %p1101_p4 = scmp.lt.s32.totalorder %s35_s28, %s35_s28 }
   0xb   :  { %p1097_p3 = scmp.ne.s32.totalorder %s35_s28, %s1096_s16  ;;  %p1102_p5 = scmp.lt.s32.totalorder %s1096_s16, %s1096_s16 }
   0xd   :  { %p1103_p6 = por %p1102_p5, %p1101_p4 }
   0xf   :  { %p1104_p7 = pnand %p1103_p6, %p1097_p3 }
  0x11   :  { %1107 = shalt.err (!%p1104_p7)
}
  0x12   :  { %37 = dma.hbm_to_vmem [thread:$0]  %s1423_s1, 96, %s35_s28, [#allocation6]  }
  0x13   :  { %s1108_s21 = scalar_lea.hbm %s1422_s0, 768 }
  0x14   :  { %p1109_p8 = scmp.ne.s32.totalorder %s1422_s0, %s1108_s21  ;;  %p1112_p9 = scmp.lt.u32.totalorder %s1108_s21, %s1422_s0 }
  0x16   :  { %p1114_p10 = pnand %p1112_p9, %p1109_p8 }
  0x18   :  { %1117 = shalt.err (!%p1114_p10)
}
  0x19   :  { %s1118_s26 = scalar_lea.vmem %s1233_s30, 768  ;;  %p1123_p12 = scmp.lt.s32.totalorder %s1233_s30, %s1233_s30 }
  0x1a   :  { %p1119_p11 = scmp.ne.s32.totalorder %s1233_s30, %s1118_s26  ;;  %p1124_p13 = scmp.lt.s32.totalorder %s1118_s26, %s1118_s26 }
  0x1c   :  { %p1125_p0 = por %p1124_p13, %p1123_p12 }
  0x1e   :  { %p1126_p1 = pnand %p1125_p0, %p1119_p11 }
  0x20   :  { %1129 = shalt.err (!%p1126_p1)
}
  0x21   :  { %s1182_s1 = smov 384   ;;  %s1183_s27 = smov 24  }
  0x22   :  { %27 = dma.hbm_to_vmem [thread:$0]  %s1422_s0, 768, %s1233_s30, [#allocation3], %s1182_s1, %s1182_s1, %s1183_s27  }
  0x23   :  { %s1184_s9 = smov [#allocation7]   ;;  %s1130_s13 = scalar_lea.hbm %s1425_s3, 6144 }
  0x24   :  { %s45_s10 = sshll.u32 %s1184_s9, 4  ;;  %p1131_p2 = scmp.ne.s32.totalorder %s1425_s3, %s1130_s13  ;;  %s46_s10 = int_to_ptr.vmem [resolvable:$true] %s45_s10 }
  0x25   :  { %p1134_p3 = scmp.lt.u32.totalorder %s1130_s13, %s1425_s3 }
  0x27   :  { %p1136_p4 = pnand %p1134_p3, %p1131_p2 }
  0x29   :  { %1139 = shalt.err (!%p1136_p4)
}
  0x2a   :  { %s1140_s18 = scalar_lea.vmem %s46_s10, 6144  ;;  %p1145_p6 = scmp.lt.s32.totalorder %s46_s10, %s46_s10 }
  0x2b   :  { %p1141_p5 = scmp.ne.s32.totalorder %s46_s10, %s1140_s18  ;;  %p1146_p7 = scmp.lt.s32.totalorder %s1140_s18, %s1140_s18 }
  0x2d   :  { %p1147_p8 = por %p1146_p7, %p1145_p6 }
  0x2f   :  { %p1148_p9 = pnand %p1147_p8, %p1141_p5 }
  0x31   :  { %1151 = shalt.err (!%p1148_p9)
}
  0x32   :  { %s1185_s0 = smov 64   ;;  %s1186_s30 = smov 4  }
  0x33   :  { %51 = dma.hbm_to_vmem [thread:$0]  %s1425_s3, 6144, %s46_s10, [#allocation6], %s1185_s0, %s1185_s0, %s1186_s30  }
  0x34   :  { %1174 = dma.done.wait [#allocation3], 768  }
  0x35   :  { %1175 = vsyncadd [#allocation3], 4294966528 }
  0x36   :  { %1176 = dma.done.wait [#allocation6], 6240  }
  0x37   :  { %1177 = vsyncadd [#allocation6], 4294961056  ;;  %v70_v0 = vld [vmem:[#allocation2] sm:$0xff]  ;;  %v71_v1 = vld [vmem:[#allocation2 + $0x8] sm:$0xff] }
  0x38   :  { %v72_v2 = vld [vmem:[#allocation2 + $0x10] sm:$0xff]  ;;  %v76_v3 = vunpack.c.l.bf16 %v70_v0  ;;  %v77_v4 = vunpack.c.h.bf16 %v70_v0  ;;  %v78_v5 = vunpack.c.l.bf16 %v71_v1  ;;  %v73_v6 = vld [vmem:[#allocation2 + $0x18] sm:$0xff]  ;;  %v74_v7 = vld [vmem:[#allocation2 + $0x20] sm:$0xff]  ;;  %v79_v11 = vunpack.c.h.bf16 %v71_v1 }
  0x39   :  { %v75_v8 = vld [vmem:[#allocation2 + $0x28] sm:$0xff]  ;;  %v82_v9 = vunpack.c.l.bf16 %v73_v6  ;;  %v83_v10 = vunpack.c.h.bf16 %v73_v6  ;;  %v84_v13 = vunpack.c.l.bf16 %v74_v7  ;;  %v85_v14 = vunpack.c.h.bf16 %v74_v7  ;;  %v1030_v28 = vld [vmem:[#allocation7 + $0x40] sm:$0xff]   ;;  %v1034_v32 = vld [vmem:[#allocation7 + $0x48] sm:$0xff]  }
  0x3a   :  { %v94_v12 = vadd.f32 %v77_v4, %v76_v3  ;;  %v80_v16 = vunpack.c.l.bf16 %v72_v2  ;;  %v86_v18 = vunpack.c.l.bf16 %v75_v8  ;;  %v81_v20 = vunpack.c.h.bf16 %v72_v2  ;;  %v1031_v29 = vld [vmem:[#allocation7] sm:$0xff]   ;;  %956 = vmatprep.subr.bf16.mxu0 %v1030_v28  ;;  %v1035_v7 = vld [vmem:[#allocation7 + $0x8] sm:$0xff]   ;;  %v1055_v28 = vld [vmem:[#allocation7 + $0x30] sm:$0xff]  }
  0x3b   :  { %v101_v15 = vadd.f32 %v83_v10, %v82_v9  ;;  %v87_v24 = vunpack.c.h.bf16 %v75_v8  ;;  %v1032_v30 = vld [vmem:[#allocation7 + $0xc0] sm:$0xff]   ;;  %957 = vmatpush3.bf16.msra.mxu0 %v1031_v29  ;;  %v1036_v8 = vld [vmem:[#allocation7 + $0xc8] sm:$0xff]   ;;  %v1057_v29 = vld [vmem:[#allocation7 + $0xb0] sm:$0xff]  }
  0x3c   :  { %v95_v17 = vadd.f32 %v94_v12, %v78_v5  ;;  %v1033_v31 = vld [vmem:[#allocation7 + $0x80] sm:$0xff]   ;;  %978 = vmatprep.subr.bf16.mxu1 %v1032_v30  ;;  %958 = vmatprep.subr.bf16.mxu0 %v1034_v32  ;;  %v1040_v12 = vld [vmem:[#allocation7 + $0xd0] sm:$0xff]   ;;  %v1058_v30 = vld [vmem:[#allocation7 + $0x78] sm:$0xff]  }
  0x3d   :  { %v102_v19 = vadd.f32 %v101_v15, %v84_v13  ;;  %979 = vmatpush3.bf16.msra.mxu1 %v1033_v31  ;;  %v1043_v15 = vld [vmem:[#allocation7 + $0x18] sm:$0xff]  }
  0x3e   :  { %v96_v21 = vadd.f32 %v95_v17, %v79_v11  ;;  %980 = vmatprep.subr.bf16.mxu1 %v1036_v8  ;;  %v1045_v17 = vld [vmem:[#allocation7 + $0x98] sm:$0xff]  }
  0x3f   :  { %v103_v22 = vadd.f32 %v102_v19, %v85_v14  ;;  %959 = vmatpush3.bf16.msra.mxu0 %v1035_v7  ;;  %v1047_v19 = vld [vmem:[#allocation7 + $0x20] sm:$0xff]   ;;  %v1060_v31 = vld [vmem:[#allocation7 + $0xf8] sm:$0xff]  }
  0x40   :  { %v97_v23 = vadd.f32 %v96_v21, %v80_v16  ;;  %v1049_v21 = vld [vmem:[#allocation7 + $0xa0] sm:$0xff]   ;;  %v1059_v32 = vld [vmem:[#allocation7 + $0x38] sm:$0xff]  }
  0x41   :  { %v104_v25 = vadd.f32 %v103_v22, %v86_v18  ;;  %v1050_v22 = vld [vmem:[#allocation7 + $0x68] sm:$0xff]  }
  0x42   :  { %v98_v26 = vadd.f32 %v97_v23, %v81_v20  ;;  %v1052_v23 = vld [vmem:[#allocation7 + $0xe8] sm:$0xff]  }
  0x43   :  { %v105_v27 = vadd.f32 %v104_v25, %v87_v24  ;;  %v1053_v25 = vld [vmem:[#allocation7 + $0xa8] sm:$0xff]  }
  0x44   :  { %99 = vadd.xlane.f32.xlu0 %v98_v26  ;;  %v1054_v26 = vld [vmem:[#allocation7 + $0x70] sm:$0xff]  }
  0x48   :  { %106 = vadd.xlane.f32.xlu0 %v105_v27  ;;  %v1056_v27 = vld [vmem:[#allocation7 + $0xf0] sm:$0xff]  }
  0xd1   :  { %v100_v33 = vpop.xlane.xlu0 %99 }
  0xd2   :  { %v109_v34 = vmul.f32 0.0013020834, %v100_v33  ;;  %v1061_v33 = vld [vmem:[#allocation7 + $0xb8] sm:$0xff]  }
  0xd4   :  { %v1279_v35 = vsub.f32 %v76_v3, %v109_v34  ;;  %v1281_v36 = vsub.f32 %v77_v4, %v109_v34  ;;  %v1283_v37 = vsub.f32 %v78_v5, %v109_v34  ;;  %v1285_v39 = vsub.f32 %v79_v11, %v109_v34  ;;  %v1039_v11 = vld [vmem:[#allocation7 + $0x10] sm:$0xff]  }
  0xd5   :  { %v107_v38 = vpop.xlane.xlu0 %106  ;;  %v1291_v43 = vsub.f32 %v80_v16, %v109_v34  ;;  %v1301_v49 = vsub.f32 %v81_v20, %v109_v34  ;;  %v1044_v16 = vld [vmem:[#allocation7 + $0xd8] sm:$0xff]   ;;  %v1048_v20 = vld [vmem:[#allocation7 + $0xe0] sm:$0xff]  }
  0xd6   :  { %v110_v40 = vmul.f32 0.0013020834, %v107_v38  ;;  %v123_v41 = vmul.f32 %v1279_v35, %v1279_v35  ;;  %v124_v42 = vmul.f32 %v1281_v36, %v1281_v36  ;;  %v125_v44 = vmul.f32 %v1283_v37, %v1283_v37  ;;  %v1062_v34 = vld [vmem:[#allocation7 + $0x140] sm:$0xff]  }
  0xd7   :  { %v126_v50 = vmul.f32 %v1285_v39, %v1285_v39  ;;  %v127_v55 = vmul.f32 %v1291_v43, %v1291_v43  ;;  %v128_v60 = vmul.f32 %v1301_v49, %v1301_v49  ;;  %v169_v38 = vlaneseq }
  0xd8   :  { %v135_v45 = vadd.f32 %v124_v42, %v123_v41  ;;  %v1295_v46 = vsub.f32 %v82_v9, %v110_v40  ;;  %v1297_v47 = vsub.f32 %v83_v10, %v110_v40  ;;  %v1299_v48 = vsub.f32 %v84_v13, %v110_v40  ;;  %v1037_v9 = vld [vmem:[#allocation7 + $0x88] sm:$0xff]   ;;  %v1038_v10 = vld [vmem:[#allocation7 + $0x50] sm:$0xff]  }
  0xd9   :  { %v1305_v52 = vsub.f32 %v85_v14, %v110_v40  ;;  %v1313_v57 = vsub.f32 %v86_v18, %v110_v40  ;;  %v1319_v62 = vsub.f32 %v87_v24, %v110_v40  ;;  %981 = vmatpush3.bf16.msra.mxu1 %v1037_v9  ;;  %960 = vmatprep.subr.bf16.mxu0 %v1038_v10  ;;  %v1041_v13 = vld [vmem:[#allocation7 + $0x90] sm:$0xff]   ;;  %v1042_v14 = vld [vmem:[#allocation7 + $0x58] sm:$0xff]   ;;  %v1046_v18 = vld [vmem:[#allocation7 + $0x60] sm:$0xff]  }
  0xda   :  { %v136_v51 = vadd.f32 %v135_v45, %v125_v44  ;;  %v129_v53 = vmul.f32 %v1295_v46, %v1295_v46  ;;  %v130_v54 = vmul.f32 %v1297_v47, %v1297_v47  ;;  %v131_v58 = vmul.f32 %v1299_v48, %v1299_v48  ;;  %961 = vmatpush3.bf16.msra.mxu0 %v1039_v11  ;;  %v1051_v24 = vld [vmem:[#allocation7 + $0x28] sm:$0xff]  }
  0xdb   :  { %v132_v63 = vmul.f32 %v1305_v52, %v1305_v52  ;;  %v133_v2 = vmul.f32 %v1313_v57, %v1313_v57  ;;  %v134_v4 = vmul.f32 %v1319_v62, %v1319_v62  ;;  %982 = vmatprep.subr.bf16.mxu1 %v1040_v12  ;;  %962 = vmatprep.subr.bf16.mxu0 %v1042_v14  ;;  %v170_v44 = vshrl.u32 %v169_v38, 7 }
  0xdc   :  { %v137_v56 = vadd.f32 %v136_v51, %v126_v50  ;;  %v142_v59 = vadd.f32 %v130_v54, %v129_v53  ;;  %v1327_v50 = vld [vmem:[#allocation5] sm:$0x3f] }
  0xdd   :  { %983 = vmatpush3.bf16.msra.mxu1 %v1041_v13  ;;  %v89_v54 = vunpack.c.l.bf16 %v1327_v50 }
  0xde   :  { %v138_v61 = vadd.f32 %v137_v56, %v127_v55  ;;  %v143_v0 = vadd.f32 %v142_v59, %v131_v58  ;;  %963 = vmatpush3.bf16.msra.mxu0 %v1043_v15  ;;  %984 = vmatprep.subr.bf16.mxu1 %v1044_v16  ;;  %v1333_v55 = vld [vmem:[%s1424_s2] sm:$0x3f]  ;;  %v175_v56 = vsub.s32 2, %v170_v44  ;;  %v183_v58 = vsub.s32 6, %v170_v44 }
  0xdf   :  { %964 = vmatprep.subr.bf16.mxu0 %v1046_v18  ;;  %v1335_v59 = vsub.s32 0, %v170_v44 }
  0xe0   :  { %v139_v1 = vadd.f32 %v138_v61, %v128_v60  ;;  %v144_v3 = vadd.f32 %v143_v0, %v132_v63  ;;  %v179_v60 = vsub.s32 4, %v170_v44  ;;  %v92_v61 = vunpack.c.l.bf16 %v1333_v55 }
  0xe1   :  { %985 = vmatpush3.bf16.msra.mxu1 %v1045_v17  ;;  %v90_v63 = vunpack.c.h.bf16 %v1327_v50  ;;  %v176_v0 = vrot.slane %v89_v54, %v175_v56  ;;  %v1076_v50 = vld [vmem:[#allocation7 + $0x178] sm:$0xff]  }
  0xe2   :  { %140 = vadd.xlane.f32.xlu1 %v139_v1  ;;  %v145_v5 = vadd.f32 %v144_v3, %v133_v2  ;;  %986 = vmatprep.subr.bf16.mxu1 %v1048_v20  ;;  %v184_v1 = vrot.slane %v89_v54, %v183_v58  ;;  %v93_v2 = vunpack.c.h.bf16 %v1333_v55  ;;  %v172_v3 = vrot.slane %v89_v54, %v1335_v59  ;;  %v405_v55 = vld [vmem:[%s1426_s4] sm:$0x1] }
  0xe3   :  { %965 = vmatpush3.bf16.msra.mxu0 %v1047_v19  ;;  %v206_v8 = vrot.slane %v176_v0, %v1335_v59  ;;  %v252_v9 = vrot.slane %v92_v61, %v183_v58  ;;  %v240_v10 = vrot.slane %v92_v61, %v1335_v59  ;;  %v248_v11 = vrot.slane %v92_v61, %v179_v60 }
  0xe4   :  { %v146_v6 = vadd.f32 %v145_v5, %v134_v4  ;;  %966 = vmatprep.subr.bf16.mxu0 %v1050_v22  ;;  %v180_v4 = vrot.slane %v89_v54, %v179_v60  ;;  %v244_v5 = vrot.slane %v92_v61, %v175_v56  ;;  %v214_v14 = vrot.slane %v184_v1, %v1335_v59 }
  0xe5   :  { %987 = vmatpush3.bf16.msra.mxu1 %v1049_v21  ;;  %v260_v15 = vrot.slane %v93_v2, %v175_v56  ;;  %v202_v17 = vrot.slane %v172_v3, %v1335_v59  ;;  %v1065_v3 = vld [vmem:[#allocation7 + $0x108] sm:$0xff]  }
  0xe6   :  { %147 = vadd.xlane.f32.xlu1 %v146_v6  ;;  %988 = vmatprep.subr.bf16.mxu1 %v1052_v23  ;;  %v192_v6 = vrot.slane %v90_v63, %v175_v56  ;;  %v210_v19 = vrot.slane %v180_v4, %v1335_v59  ;;  %v282_v23 = vrot.slane %v252_v9, %v1335_v59  ;;  %v1063_v56 = vld [vmem:[#allocation7 + $0x100] sm:$0xff]   ;;  %v1066_v4 = vld [vmem:[#allocation7 + $0x150] sm:$0xff]  }
  0xe7   :  { %967 = vmatpush3.bf16.msra.mxu0 %v1051_v24  ;;  %v278_v24 = vrot.slane %v248_v11, %v1335_v59  ;;  %v1070_v9 = vld [vmem:[#allocation7 + $0x160] sm:$0xff]   ;;  %v1072_v11 = vld [vmem:[#allocation7 + $0x168] sm:$0xff]  }
  0xe8   :  { %968 = vmatprep.subr.bf16.mxu0 %v1054_v26  ;;  %v222_v20 = vrot.slane %v192_v6, %v1335_v59  ;;  %v1068_v6 = vld [vmem:[#allocation7 + $0x158] sm:$0xff]  }
  0xe9   :  { %989 = vmatpush3.bf16.msra.mxu1 %v1053_v25 }
  0xea   :  { %990 = vmatprep.subr.bf16.mxu1 %v1056_v27 }
  0xeb   :  { %969 = vmatpush3.bf16.msra.mxu0 %v1055_v28 }
  0xec   :  { %970 = vmatprep.subr.bf16.mxu0 %v1058_v30 }
  0xed   :  { %991 = vmatpush3.bf16.msra.mxu1 %v1057_v29 }
  0xee   :  { %992 = vmatprep.subr.bf16.mxu1 %v1060_v31 }
  0xef   :  { %971 = vmatpush3.bf16.msra.mxu0 %v1059_v32 }
  0xf0   :  { %1000 = vmatprep.subr.bf16.mxu0 %v1062_v34 }
  0xf1   :  { %993 = vmatpush3.bf16.msra.mxu1 %v1061_v33 }
 0x16f   :  { %v141_v40 = vpop.xlane.xlu1 %140 }
 0x170   :  { %v149_v41 = vmul.f32 0.0013020834, %v141_v40 }
 0x172   :  { %v151_v42 = vadd.f32 1e-05, %v149_v41 }
 0x173   :  { %v148_v45 = vpop.xlane.xlu1 %147 }
 0x174   :  { %1078 = vrsqrt.f32 %v151_v42  ;;  %v150_v51 = vmul.f32 0.0013020834, %v148_v45 }
 0x176   :  { %v152_v53 = vadd.f32 1e-05, %v150_v51 }
 0x178   :  { %1080 = vrsqrt.f32 %v152_v53 }
 0x17e   :  { %v1343_v7 = vpop.eup %1078 }
 0x17f   :  { %v156_v12 = vmul.f32 %v1343_v7, %v1281_v36  ;;  %v158_v13 = vmul.f32 %v1343_v7, %v1285_v39  ;;  %v155_v16 = vmul.f32 %v1343_v7, %v1279_v35  ;;  %v157_v18 = vmul.f32 %v1343_v7, %v1283_v37 }
 0x180   :  { %v274_v36 = vrot.slane %v244_v5, %v1335_v59  ;;  %v160_v39 = vmul.f32 %v1343_v7, %v1301_v49  ;;  %v270_v35 = vrot.slane %v240_v10, %v1335_v59  ;;  %v290_v49 = vrot.slane %v260_v15, %v1335_v59  ;;  %v1067_v5 = vld [vmem:[#allocation7 + $0x110] sm:$0xff]   ;;  %v1071_v10 = vld [vmem:[#allocation7 + $0x120] sm:$0xff]  }
 0x181   :  { %v224_v22 = vmul.f32 %v206_v8, %v156_v12  ;;  %v226_v26 = vmul.f32 %v214_v14, %v158_v13  ;;  %v223_v28 = vmul.f32 %v202_v17, %v155_v16  ;;  %v225_v30 = vmul.f32 %v210_v19, %v157_v18  ;;  %v1073_v13 = vld [vmem:[#allocation7 + $0x128] sm:$0xff]  }
 0x182   :  { %v1364_v21 = vpop.eup %1080  ;;  %v188_v12 = vrot.slane %v90_v63, %v1335_v59  ;;  %v159_v16 = vmul.f32 %v1343_v7, %v1291_v43  ;;  %v256_v18 = vrot.slane %v93_v2, %v1335_v59  ;;  %v406_v2 = vunpack.c.l.bf16 %v405_v55 }
 0x183   :  { %v162_v37 = vmul.f32 %v1364_v21, %v1297_v47  ;;  %v164_v25 = vmul.f32 %v1364_v21, %v1305_v52  ;;  %v161_v27 = vmul.f32 %v1364_v21, %v1295_v46  ;;  %v163_v29 = vmul.f32 %v1364_v21, %v1299_v48 }
 0x184   :  { %v166_v33 = vmul.f32 %v1364_v21, %v1319_v62  ;;  %v228_v47 = vmul.f32 %v222_v20, %v160_v39  ;;  %v292_v34 = vadd.f32 %v274_v36, %v224_v22  ;;  %v294_v41 = vadd.f32 %v282_v23, %v226_v26  ;;  %v1064_v62 = vld [vmem:[#allocation7 + $0x148] sm:$0xff]  }
 0x185   :  { %v230_v31 = vmul.f32 %v206_v8, %v162_v37  ;;  %v232_v32 = vmul.f32 %v214_v14, %v164_v25  ;;  %v229_v38 = vmul.f32 %v202_v17, %v161_v27  ;;  %v231_v52 = vmul.f32 %v210_v19, %v163_v29  ;;  %v1069_v8 = vld [vmem:[#allocation7 + $0x118] sm:$0xff]   ;;  %v1074_v14 = vld [vmem:[#allocation7 + $0x170] sm:$0xff]  }
 0x186   :  { %v234_v44 = vmul.f32 %v222_v20, %v166_v33  ;;  %v291_v45 = vadd.f32 %v270_v35, %v223_v28  ;;  %v293_v51 = vadd.f32 %v278_v24, %v225_v30  ;;  %v296_v58 = vadd.f32 %v290_v49, %v228_v47  ;;  %v1075_v19 = vld [vmem:[#allocation7 + $0x130] sm:$0xff]   ;;  %v1077_v20 = vld [vmem:[#allocation7 + $0x138] sm:$0xff]  }
 0x187   :  { %v298_v40 = vadd.f32 %v274_v36, %v230_v31  ;;  %v300_v42 = vadd.f32 %v282_v23, %v232_v32  ;;  %v297_v46 = vadd.f32 %v270_v35, %v229_v38  ;;  %v299_v53 = vadd.f32 %v278_v24, %v231_v52 }
 0x188   :  { %v302_v60 = vadd.f32 %v290_v49, %v234_v44  ;;  %v165_v15 = vmul.f32 %v1364_v21, %v1313_v57  ;;  %v218_v17 = vrot.slane %v188_v12, %v1335_v59  ;;  %v286_v39 = vrot.slane %v256_v18, %v1335_v59 }
 0x189   :  { %v304_v54 = vpack.c.bf16 %v298_v40, %v292_v34  ;;  %v306_v48 = vpack.c.bf16 %v300_v42, %v294_v41  ;;  %v303_v61 = vpack.c.bf16 %v297_v46, %v291_v45  ;;  %v305_v0 = vpack.c.bf16 %v299_v53, %v293_v51 }
 0x18a   :  { %v308_v1 = vpack.c.bf16 %v302_v60, %v296_v58  ;;  %v233_v63 = vmul.f32 %v218_v17, %v165_v15  ;;  %v227_v36 = vmul.f32 %v218_v17, %v159_v16  ;;  %v410_v23 = vrot.slane %v406_v2, %v1335_v59  ;;  %v948_v15 = vld [vmem:[%s1429_s7] sm:$0xff]  }
 0x18b   :  { %731 = vmatprep.mubr.bf16.mxu0 %v304_v54  ;;  %772 = vmatprep.mubr.bf16.mxu1 %v306_v48 }
 0x18c   :  { %732 = vmatmul.mubr.bf16.vlgmr.msra.gmra.mrb[0].mxu0 %v303_v61  ;;  %773 = vmatmul.mubr.bf16.vlgmr.msra.gmra.mrb[0].mxu1 %v305_v0  ;;  %v301_v57 = vadd.f32 %v286_v39, %v233_v63  ;;  %v295_v21 = vadd.f32 %v286_v39, %v227_v36  ;;  %v950_v63 = vunpack.c.h.bf16 %v948_v15 }
 0x18d   :  { %1001 = vmatpush3.bf16.msra.mxu0 %v1063_v56  ;;  %813 = vmatprep.mubr.bf16.mxu0 %v308_v1 }
 0x18e   :  { %1002 = vmatprep.subr.bf16.mxu0 %v1064_v62  ;;  %v307_v43 = vpack.c.bf16 %v301_v57, %v295_v21 }
 0x191   :  { %1003 = vmatpush3.bf16.msra.mxu0 %v1065_v3 }
 0x192   :  { %1004 = vmatprep.subr.bf16.mxu0 %v1066_v4 }
 0x195   :  { %1005 = vmatpush3.bf16.msra.mxu0 %v1067_v5  ;;  %v822_v5 = vld [vmem:[%s1427_s5] sm:$0x1]  ;;  %s1187_s5 = smov [#allocation8]  }
 0x196   :  { %1006 = vmatprep.subr.bf16.mxu0 %v1068_v6  ;;  %v824_v6 = vld [vmem:[%s1428_s6] sm:$0x1]  ;;  %s882_s6 = sshll.u32 %s1187_s5, 4  ;;  %s883_s6 = int_to_ptr.vmem [resolvable:$true] %s882_s6 }
 0x197   :  { %s1152_s27 = scalar_lea.vmem %s883_s6, 128  ;;  %p1157_p11 = scmp.lt.s32.totalorder %s883_s6, %s883_s6 }
 0x198   :  { %p1153_p10 = scmp.ne.s32.totalorder %s883_s6, %s1152_s27  ;;  %p1158_p12 = scmp.lt.s32.totalorder %s1152_s27, %s1152_s27 }
 0x199   :  { %1007 = vmatpush3.bf16.msra.mxu0 %v1069_v8  ;;  %v823_v8 = vunpack.c.l.bf16 %v822_v5 }
 0x19a   :  { %1008 = vmatprep.subr.bf16.mxu0 %v1070_v9  ;;  %v825_v9 = vunpack.c.l.bf16 %v824_v6  ;;  %p1159_p13 = por %p1158_p12, %p1157_p11 }
 0x19c   :  { %p1160_p0 = pnand %p1159_p13, %p1153_p10 }
 0x19d   :  { %1009 = vmatpush3.bf16.msra.mxu0 %v1071_v10  ;;  %v852_v10 = vrot.slane %v823_v8, %v1335_v59 }
 0x19e   :  { %1010 = vmatprep.subr.bf16.mxu0 %v1072_v11 }
 0x1a1   :  { %1011 = vmatpush3.bf16.msra.mxu0 %v1073_v13  ;;  %v858_v13 = vrot.slane %v825_v9, %v1335_v59 }
 0x1a2   :  { %1012 = vmatprep.subr.bf16.mxu0 %v1074_v14 }
 0x1a5   :  { %1013 = vmatpush3.bf16.msra.mxu0 %v1075_v19 }
 0x1a6   :  { %1014 = vmatprep.subr.bf16.mxu0 %v1076_v50  ;;  %v949_v50 = vunpack.c.l.bf16 %v948_v15 }
 0x1a9   :  { %1015 = vmatpush3.bf16.msra.mxu0 %v1077_v20 }
 0x1ac   :  { %814 = vmatmul.mubr.bf16.vlgmr.msra.gmra.mrb[4].mxu0 %v307_v43 }
 0x25f   :  { %v972_v7 = vpop.f32.mrb[0].mxu0  ;;  %v994_v22 = vpop.f32.mrb[0].mxu1 }
 0x260   :  { %v973_v35 = vpop.f32.mrb[1].mxu0  ;;  %v995_v24 = vpop.f32.mrb[1].mxu1 }
 0x261   :  { %v974_v37 = vadd.f32 %v973_v35, %v972_v7  ;;  %v996_v25 = vadd.f32 %v995_v24, %v994_v22  ;;  %v975_v26 = vpop.f32.mrb[2].mxu0  ;;  %v997_v49 = vpop.f32.mrb[2].mxu1 }
 0x262   :  { %v976_v27 = vpop.f32.mrb[3].mxu0  ;;  %v998_v28 = vpop.f32.mrb[3].mxu1 }
 0x263   :  { %v734_v29 = vadd.f32 %v974_v37, %v410_v23  ;;  %v977_v30 = vadd.f32 %v976_v27, %v975_v26  ;;  %v999_v31 = vadd.f32 %v998_v28, %v997_v49 }
 0x265   :  { %v775_v32 = vadd.f32 %v996_v25, %v734_v29  ;;  %v737_v33 = vadd.f32 %v977_v30, %v410_v23 }
 0x267   :  { %v778_v47 = vadd.f32 %v999_v31, %v737_v33 }
 0x27f   :  { %v1016_v34 = vpop.f32.mrb[4].mxu0 }
 0x280   :  { %v1017_v38 = vpop.f32.mrb[5].mxu0 }
 0x281   :  { %v1018_v52 = vadd.f32 %v1017_v38, %v1016_v34  ;;  %v1019_v40 = vpop.f32.mrb[6].mxu0 }
 0x282   :  { %v1020_v41 = vpop.f32.mrb[7].mxu0 }
 0x283   :  { %v1021_v42 = vadd.f32 %v1020_v41, %v1019_v40  ;;  %v816_v44 = vadd.f32 %v1018_v52, %v775_v32 }
 0x285   :  { %826 = vadd.xlane.f32.xlu0 %v816_v44  ;;  %v819_v45 = vadd.f32 %v1021_v42, %v778_v47 }
 0x287   :  { %828 = vadd.xlane.f32.xlu1 %v819_v45 }
 0x312   :  { %v827_v46 = vpop.xlane.xlu0 %826 }
 0x313   :  { %v831_v51 = vmul.f32 0.0078125, %v827_v46 }
 0x314   :  { %v829_v53 = vpop.xlane.xlu1 %828 }
 0x315   :  { %v833_v54 = vsub.f32 %v816_v44, %v831_v51  ;;  %v832_v48 = vmul.f32 0.0078125, %v829_v53 }
 0x317   :  { %v834_v56 = vsub.f32 %v819_v45, %v832_v48  ;;  %v835_v58 = vmul.f32 %v833_v54, %v833_v54 }
 0x319   :  { %837 = vadd.xlane.f32.xlu0 %v835_v58  ;;  %v836_v60 = vmul.f32 %v834_v56, %v834_v56 }
 0x31b   :  { %839 = vadd.xlane.f32.xlu1 %v836_v60 }
 0x3a6   :  { %v838_v61 = vpop.xlane.xlu0 %837 }
 0x3a7   :  { %v841_v0 = vmul.f32 0.0078125, %v838_v61 }
 0x3a8   :  { %v840_v62 = vpop.xlane.xlu1 %839 }
 0x3a9   :  { %v843_v1 = vadd.f32 1e-05, %v841_v0  ;;  %v842_v3 = vmul.f32 0.0078125, %v840_v62 }
 0x3ab   :  { %1082 = vrsqrt.f32 %v843_v1  ;;  %v844_v4 = vadd.f32 1e-05, %v842_v3 }
 0x3ad   :  { %1084 = vrsqrt.f32 %v844_v4 }
 0x3b5   :  { %v1083_v11 = vpop.eup %1082 }
 0x3b6   :  { %v847_v12 = vmul.f32 %v1083_v11, %v833_v54 }
 0x3b7   :  { %v1085_v14 = vpop.eup %1084 }
 0x3b8   :  { %v848_v16 = vmul.f32 %v1085_v14, %v834_v56  ;;  %v853_v17 = vmul.f32 %v852_v10, %v847_v12 }
 0x3ba   :  { %v854_v18 = vmul.f32 %v852_v10, %v848_v16  ;;  %v859_v19 = vadd.f32 %v858_v13, %v853_v17 }
 0x3bc   :  { %v860_v36 = vadd.f32 %v858_v13, %v854_v18  ;;  %v865_v39 = vadd.f32 %v949_v50, %v859_v19 }
 0x3be   :  { %v866_v20 = vadd.f32 %v950_v63, %v860_v36 }
 0x3c0   :  { %v954_v57 = vpack.c.bf16 %v866_v20, %v865_v39 }
 0x3c2   :  { %955 = vst [vmem:[#allocation8] sm:$0xff] %v954_v57  }
 0x3c3   :  { %1163 = shalt.err (!%p1160_p0)
}
 0x3c4   :  { %s1164_s29 = scalar_lea.hbm %s1430_s8, 128 }
 0x3c5   :  { %p1165_p1 = scmp.ne.s32.totalorder %s1430_s8, %s1164_s29  ;;  %p1168_p2 = scmp.lt.u32.totalorder %s1164_s29, %s1430_s8 }
 0x3c7   :  { %p1170_p3 = pnand %p1168_p2, %p1165_p1 }
 0x3c9   :  { %1173 = shalt.err (!%p1170_p3)
}
 0x3ca   :  { %888 = dma.vmem_to_hbm [thread:$0]  %s883_s6, 128, %s1430_s8, [#allocation4], %s1185_s0, %s1185_s0, %s1186_s30  }
 0x3cb   :  { %1178 = dma.done.wait [#allocation4], 128  }
 0x3cc   :  { %1179 = vsyncadd [#allocation4], 4294967168 }
 0x3cd   :  { %892 = vsyncpa [#allocation3], 1 }
 0x3ce   :  { %893 = vsyncpa [#allocation6], 1 }
 0x3cf   :  { %894 = vsyncpa [#allocation4], 1 }

</bundles_post_ra>
